<compile_context>
chip_gen: v7x
topology: tpu7x:2x2x1
jax: 0.10.0
libtpu: 0.0.40
codegen_flags: <defaults>
</compile_context>

<pallas_src>
import jax
import jax.numpy as jnp
from jax.experimental import pallas as pl
from jax.experimental.pallas import tpu as pltpu


def _round_up(x, m):
    return (x + m - 1) // m * m


def _fused_mlp_kernel(x_ref, w_ref, b_ref, clamp_ref, o_ref):
    """Push one batch tile through the whole MLP.

    x_ref     : [TB, Dpad]       activation tile (f32, VMEM)
    w_ref     : [L, Dpad, Dpad]  zero-padded weight slab (resident in VMEM)
    b_ref     : [L, 1, Dpad]     zero-padded bias slab  (resident in VMEM)
    clamp_ref : [1]              2*PBESSmax (SMEM scalar)
    o_ref     : [TB, Dpad]       lane-dense output tile (only column 0 is real)
    """
    num_layers = w_ref.shape[0]
    act = x_ref[...]
    # Static Python loop over layers (L known at trace time). Activations never
    # leave the chip between layers.
    for l in range(num_layers):
        y = jnp.dot(act, w_ref[l], preferred_element_type=jnp.float32)  # MXU
        y = y + b_ref[l]                      # [1, Dpad] broadcast over batch tile
        y = jnp.maximum(y, 0.0)               # ReLU
        if l == num_layers - 1:
            y = jnp.minimum(y, clamp_ref[0])  # torch.clamp(..., max=2*PBESSmax)
        act = y
    o_ref[...] = act.astype(o_ref.dtype)


def deep_mlp_forward(params, x, PBESSmax):
    """params: list of (W[in,out], b[out]); x: [B, input_size] -> [B, 1]."""
    B, In = x.shape
    L = len(params)
    dims = [In] + [w.shape[1] for (w, _) in params]
    Dpad = _round_up(max(dims), 128)          # lane-aligned common feature width
    TB = min(_round_up(B, 8), 128)            # batch tile: sublane-aligned, <=128
    Bpad = _round_up(B, TB)

    # Zero-pad the input and pack all layer weights/biases into 128-aligned slabs.
    x_pad = jnp.zeros((Bpad, Dpad), jnp.float32).at[:B, :In].set(
        x.astype(jnp.float32))
    w_slab = jnp.zeros((L, Dpad, Dpad), jnp.float32)
    b_slab = jnp.zeros((L, 1, Dpad), jnp.float32)
    for l, (w, b) in enumerate(params):
        fi, fo = w.shape
        w_slab = w_slab.at[l, :fi, :fo].set(w.astype(jnp.float32))
        b_slab = b_slab.at[l, 0, :fo].set(b.astype(jnp.float32))
    clamp = jnp.asarray([2.0 * float(PBESSmax)], jnp.float32)

    # VMEM budget: double-buffered x/out tiles + resident weight/bias slabs.
    # TODO(synk): for very large hidden sizes, also tile the feature (K/N) dims
    # instead of keeping the whole weight slab resident.
    vmem_needed = 4 * (4 * TB * Dpad + L * Dpad * (Dpad + 1) + 2 * TB * Dpad)
    vmem_limit = int(max(vmem_needed + (4 << 20), 16 << 20))

    out = pl.pallas_call(
        _fused_mlp_kernel,
        out_shape=jax.ShapeDtypeStruct((Bpad, Dpad), jnp.float32),
        grid_spec=pltpu.PrefetchScalarGridSpec(
            num_scalar_prefetch=0,
            grid=(Bpad // TB,),
            in_specs=[
                pl.BlockSpec((TB, Dpad), lambda i: (i, 0)),        # activations
                pl.BlockSpec((L, Dpad, Dpad), lambda i: (0, 0, 0)),  # weights (resident)
                pl.BlockSpec((L, 1, Dpad), lambda i: (0, 0, 0)),     # biases  (resident)
                pl.BlockSpec(memory_space=pltpu.MemorySpace.SMEM),   # clamp scalar
            ],
            out_specs=pl.BlockSpec((TB, Dpad), lambda i: (i, 0)),
        ),
        compiler_params=pltpu.CompilerParams(
            dimension_semantics=("parallel",),   # batch tiles independent (2x on v7x)
            vmem_limit_bytes=vmem_limit,
        ),
    )(x_pad, w_slab, b_slab, clamp)

    return out[:B, :1]


def init_deep_mlp_params(key, input_size, hidden_sizes):
    """Deterministic init mimicking nn.Linear (uniform +-1/sqrt(fan_in)).
    Weights stored as [in, out] (transposed from PyTorch's [out, in])."""
    params = []
    dims = [input_size] + list(hidden_sizes) + [1]
    for i in range(len(dims) - 1):
        fan_in, fan_out = dims[i], dims[i + 1]
        key, kw, kb = jax.random.split(key, 3)
        bound = 1.0 / jnp.sqrt(jnp.float32(fan_in))
        w = jax.random.uniform(kw, (fan_in, fan_out), jnp.float32, -bound, bound)
        b = jax.random.uniform(kb, (fan_out,), jnp.float32, -bound, bound)
        params.append((w, b))
    return params


if __name__ == "__main__":
    key = jax.random.PRNGKey(0)

    batch = 2
    input_size = 16
    hidden_sizes = [32, 32]
    PBESSmax = 1.5

    key, kx, kp = jax.random.split(key, 3)
    x = jax.random.normal(kx, (batch, input_size), jnp.float32)
    params = init_deep_mlp_params(kp, input_size, hidden_sizes)

    out = deep_mlp_forward(params, x, PBESSmax)
    out = jax.block_until_ready(out)

    # Pure-JAX reference (same math, no Pallas).
    ref = x
    for w, b in params[:-1]:
        ref = jnp.maximum(ref @ w + b, 0.0)
    w, b = params[-1]
    ref = jnp.minimum(jnp.maximum(ref @ w + b, 0.0), 2.0 * PBESSmax)

    assert out.shape == (batch, 1)
    assert jnp.allclose(out, ref, atol=1e-5, rtol=1e-5)

    print("KERNEL_OK")
</pallas_src>

<mosaic_0001>
module attributes {stable_mosaic.version = 11 : i64} {
  func.func @_fused_mlp_kernel(%arg0: i32, %arg1: memref<8x128xf32, #tpu.memory_space<vmem>>, %arg2: memref<3x128x128xf32, #tpu.memory_space<vmem>>, %arg3: memref<3x1x128xf32, #tpu.memory_space<vmem>>, %arg4: memref<1xf32, #tpu.memory_space<smem>>, %arg5: memref<8x128xf32, #tpu.memory_space<vmem>>) attributes {dimension_semantics = [#tpu.dimension_semantics<parallel>], iteration_bounds = array<i64: 1>, scalar_prefetch = 0 : i64, scratch_operands = 0 : i64, tpu.core_type = #tpu.core_type<tc>, window_params = [{transform_indices = @transform_0, window_bounds = array<i64: 8, 128>}, {pipeline_mode = #tpu.pipeline_mode<synchronous>, transform_indices = @transform_1, window_bounds = array<i64: 3, 128, 128>}, {pipeline_mode = #tpu.pipeline_mode<synchronous>, transform_indices = @transform_2, window_bounds = array<i64: 3, 1, 128>}, {transform_indices = @transform_3, window_bounds = array<i64: 1>}, {transform_indices = @transform_4, window_bounds = array<i64: 8, 128>}]} {
    %c0 = arith.constant 0 : index
    %c0_0 = arith.constant 0 : index
    %0 = vector.load %arg1[%c0, %c0_0] : memref<8x128xf32, #tpu.memory_space<vmem>>, vector<8x128xf32>
    %c0_1 = arith.constant 0 : index
    %c0_2 = arith.constant 0 : index
    %c0_3 = arith.constant 0 : index
    %1 = vector.load %arg2[%c0_1, %c0_2, %c0_3] : memref<3x128x128xf32, #tpu.memory_space<vmem>>, vector<1x128x128xf32>
    %2 = vector.shape_cast %1 : vector<1x128x128xf32> to vector<128x128xf32>
    %cst = arith.constant dense<0.000000e+00> : vector<8x128xf32>
    %3 = tpu.matmul %0, %2, %cst {dimension_numbers = #tpu.dot_dimension_numbers<[1], [0], [0], [1], [0, 0, 1, 1], [], []>} : vector<8x128xf32>, vector<128x128xf32>, vector<8x128xf32> -> vector<8x128xf32>
    %c0_4 = arith.constant 0 : index
    %c0_5 = arith.constant 0 : index
    %c0_6 = arith.constant 0 : index
    %4 = vector.load %arg3[%c0_4, %c0_5, %c0_6] : memref<3x1x128xf32, #tpu.memory_space<vmem>>, vector<1x1x128xf32>
    %5 = vector.shape_cast %4 : vector<1x1x128xf32> to vector<1x128xf32>
    %6 = vector.broadcast %5 : vector<1x128xf32> to vector<8x128xf32>
    %7 = arith.addf %3, %6 : vector<8x128xf32>
    %cst_7 = arith.constant 0.000000e+00 : f32
    %8 = vector.broadcast %cst_7 : f32 to vector<8x128xf32>
    %9 = arith.maximumf %7, %8 : vector<8x128xf32>
    %c1 = arith.constant 1 : index
    %c0_8 = arith.constant 0 : index
    %c0_9 = arith.constant 0 : index
    %10 = vector.load %arg2[%c1, %c0_8, %c0_9] : memref<3x128x128xf32, #tpu.memory_space<vmem>>, vector<1x128x128xf32>
    %11 = vector.shape_cast %10 : vector<1x128x128xf32> to vector<128x128xf32>
    %cst_10 = arith.constant dense<0.000000e+00> : vector<8x128xf32>
    %12 = tpu.matmul %9, %11, %cst_10 {dimension_numbers = #tpu.dot_dimension_numbers<[1], [0], [0], [1], [0, 0, 1, 1], [], []>} : vector<8x128xf32>, vector<128x128xf32>, vector<8x128xf32> -> vector<8x128xf32>
    %c1_11 = arith.constant 1 : index
    %c0_12 = arith.constant 0 : index
    %c0_13 = arith.constant 0 : index
    %13 = vector.load %arg3[%c1_11, %c0_12, %c0_13] : memref<3x1x128xf32, #tpu.memory_space<vmem>>, vector<1x1x128xf32>
    %14 = vector.shape_cast %13 : vector<1x1x128xf32> to vector<1x128xf32>
    %15 = vector.broadcast %14 : vector<1x128xf32> to vector<8x128xf32>
    %16 = arith.addf %12, %15 : vector<8x128xf32>
    %cst_14 = arith.constant 0.000000e+00 : f32
    %17 = vector.broadcast %cst_14 : f32 to vector<8x128xf32>
    %18 = arith.maximumf %16, %17 : vector<8x128xf32>
    %c2 = arith.constant 2 : index
    %c0_15 = arith.constant 0 : index
    %c0_16 = arith.constant 0 : index
    %19 = vector.load %arg2[%c2, %c0_15, %c0_16] : memref<3x128x128xf32, #tpu.memory_space<vmem>>, vector<1x128x128xf32>
    %20 = vector.shape_cast %19 : vector<1x128x128xf32> to vector<128x128xf32>
    %cst_17 = arith.constant dense<0.000000e+00> : vector<8x128xf32>
    %21 = tpu.matmul %18, %20, %cst_17 {dimension_numbers = #tpu.dot_dimension_numbers<[1], [0], [0], [1], [0, 0, 1, 1], [], []>} : vector<8x128xf32>, vector<128x128xf32>, vector<8x128xf32> -> vector<8x128xf32>
    %c2_18 = arith.constant 2 : index
    %c0_19 = arith.constant 0 : index
    %c0_20 = arith.constant 0 : index
    %22 = vector.load %arg3[%c2_18, %c0_19, %c0_20] : memref<3x1x128xf32, #tpu.memory_space<vmem>>, vector<1x1x128xf32>
    %23 = vector.shape_cast %22 : vector<1x1x128xf32> to vector<1x128xf32>
    %24 = vector.broadcast %23 : vector<1x128xf32> to vector<8x128xf32>
    %25 = arith.addf %21, %24 : vector<8x128xf32>
    %cst_21 = arith.constant 0.000000e+00 : f32
    %26 = vector.broadcast %cst_21 : f32 to vector<8x128xf32>
    %27 = arith.maximumf %25, %26 : vector<8x128xf32>
    %c0_22 = arith.constant 0 : index
    %28 = memref.load %arg4[%c0_22] : memref<1xf32, #tpu.memory_space<smem>>
    %29 = vector.broadcast %28 : f32 to vector<8x128xf32>
    %30 = arith.minimumf %27, %29 : vector<8x128xf32>
    %c0_23 = arith.constant 0 : index
    %c0_24 = arith.constant 0 : index
    %31 = vector.load %arg5[%c0_23, %c0_24] : memref<8x128xf32, #tpu.memory_space<vmem>>, vector<8x128xf32>
    tpu.vector_store %arg5[%c0_23, %c0_24], %30 {strides = array<i32>} : memref<8x128xf32, #tpu.memory_space<vmem>>, vector<8x128xf32>,
    return
  }
  func.func @transform_0(%arg0: i32) -> (i32, i32) {
    %c0_i32 = arith.constant 0 : i32
    %c0_i32_0 = arith.constant 0 : i32
    return %arg0, %c0_i32 : i32, i32
  }
  func.func @transform_1(%arg0: i32) -> (i32, i32, i32) {
    %c0_i32 = arith.constant 0 : i32
    %c0_i32_0 = arith.constant 0 : i32
    %c0_i32_1 = arith.constant 0 : i32
    %c0_i32_2 = arith.constant 0 : i32
    return %c0_i32, %c0_i32_0, %c0_i32_1 : i32, i32, i32
  }
  func.func @transform_2(%arg0: i32) -> (i32, i32, i32) {
    %c0_i32 = arith.constant 0 : i32
    %c0_i32_0 = arith.constant 0 : i32
    %c0_i32_1 = arith.constant 0 : i32
    %c0_i32_2 = arith.constant 0 : i32
    return %c0_i32, %c0_i32_0, %c0_i32_1 : i32, i32, i32
  }
  func.func @transform_3(%arg0: i32) -> i32 {
    %c0_i32 = arith.constant 0 : i32
    %c0_i32_0 = arith.constant 0 : i32
    return %c0_i32 : i32
  }
  func.func @transform_4(%arg0: i32) -> (i32, i32) {
    %c0_i32 = arith.constant 0 : i32
    %c0_i32_0 = arith.constant 0 : i32
    return %arg0, %c0_i32 : i32, i32
  }
}

</mosaic_0001>

<bundles_post_ra>
// kernel: tpu_custom_call.1
= control target key start
LH: loop header
LB: loop body
LE: loop exit
PB: predicated region body
PF: predicated region fallthrough
CT: control target
= control target key end

     0   :  { %10 = vsyncpa [#allocation4], 0  ;;  %s783_s0 = inlined_call_operand.hbm [shape: f32[8,128], index: 0, kind: input, shape index: {}]   ;;  %s784_s1 = inlined_call_operand.hbm [shape: f32[3,128,128], index: 1, kind: input, shape index: {}]   ;;  %s785_s2 = inlined_call_operand.vmem [shape: f32[3,1,128], index: 2, kind: input, shape index: {}]   ;;  %s786_s3 = inlined_call_operand.<no memory space> [shape: f32[1], index: 3, kind: input, shape index: {}]   ;;  %s787_s4 = inlined_call_operand.hbm [shape: f32[8,128], index: 4, kind: output, shape index: {}]  }
   0x1   :  { %11 = vsyncpa [#allocation7], 0 }
   0x2   :  { %12 = vsyncpa [#allocation5], 0  ;;  %s665_s15 = smov [#allocation3]   ;;  %s666_s17 = smov [#allocation6]  }
   0x3   :  { %s19_s16 = sshll.u32 %s665_s15, 4  ;;  %s28_s18 = sshll.u32 %s666_s17, 4  ;;  %s20_s16 = int_to_ptr.vmem [resolvable:$true] %s19_s16  ;;  %s698_s18 = int_to_ptr.vmem [resolvable:$true] %s28_s18 }
   0x4   :  { %s593_s21 = scalar_lea.hbm %s783_s0, 128 }
   0x5   :  { %p594_p0 = scmp.ne.s32.totalorder %s783_s0, %s593_s21  ;;  %p597_p1 = scmp.lt.u32.totalorder %s593_s21, %s783_s0 }
   0x7   :  { %p599_p2 = pnand %p597_p1, %p594_p0 }
   0x9   :  { %602 = shalt.err (!%p599_p2)
}
   0xa   :  { %s603_s26 = scalar_lea.vmem %s20_s16, 128  ;;  %p608_p4 = scmp.lt.s32.totalorder %s20_s16, %s20_s16 }
   0xb   :  { %p604_p3 = scmp.ne.s32.totalorder %s20_s16, %s603_s26  ;;  %p609_p5 = scmp.lt.s32.totalorder %s603_s26, %s603_s26 }
   0xd   :  { %p610_p6 = por %p609_p5, %p608_p4 }
   0xf   :  { %p611_p7 = pnand %p610_p6, %p604_p3 }
  0x11   :  { %614 = shalt.err (!%p611_p7)
}
  0x12   :  { %22 = dma.hbm_to_vmem [thread:$0]  %s783_s0, 128, %s20_s16, [#allocation4]  }
  0x13   :  { %s615_s5 = scalar_lea.hbm %s784_s1, 6144 }
  0x14   :  { %p616_p8 = scmp.ne.s32.totalorder %s784_s1, %s615_s5  ;;  %p619_p9 = scmp.lt.u32.totalorder %s615_s5, %s784_s1 }
  0x16   :  { %p621_p10 = pnand %p619_p9, %p616_p8 }
  0x18   :  { %624 = shalt.err (!%p621_p10)
}
  0x19   :  { %s625_s10 = scalar_lea.vmem %s698_s18, 6144  ;;  %p630_p12 = scmp.lt.s32.totalorder %s698_s18, %s698_s18 }
  0x1a   :  { %p626_p11 = scmp.ne.s32.totalorder %s698_s18, %s625_s10  ;;  %p631_p13 = scmp.lt.s32.totalorder %s625_s10, %s625_s10 }
  0x1c   :  { %p632_p0 = por %p631_p13, %p630_p12 }
  0x1e   :  { %p633_p1 = pnand %p632_p0, %p626_p11 }
  0x20   :  { %636 = shalt.err (!%p633_p1)
}
  0x21   :  { %s667_s0 = smov 128   ;;  %s668_s11 = smov 8  }
  0x22   :  { %34 = dma.hbm_to_vmem [thread:$0]  %s784_s1, 6144, %s698_s18, [#allocation7], %s667_s0, %s667_s0, %s668_s11  }
  0x23   :  { %659 = dma.done.wait [#allocation4], 128  }
  0x24   :  { %660 = vsyncadd [#allocation4], 4294967168 }
  0x25   :  { %661 = dma.done.wait [#allocation7], 6144  }
  0x26   :  { %662 = vsyncadd [#allocation7], 4294961152  ;;  %v669_v0 = vmov 0.0|0.0   ;;  %vm670_vm0 = vmmov 0   ;;  %v671_v1 = vmov 0.0   ;;  %v46_v2 = vld [vmem:[#allocation6] sm:$0xff] }
  0x27   :  { %513 = vmatprep.subr.bf16.mxu0 %v669_v0  ;;  %440 = vmatprep.mubr.msk.f32.mxu0 %vm670_vm0, %v671_v1  ;;  %v47_v3 = vld [vmem:[#allocation6 + $0x8] sm:$0xff]  ;;  %v48_v4 = vld [vmem:[#allocation6 + $0x10] sm:$0xff]  ;;  %v49_v6 = vld [vmem:[#allocation6 + $0x18] sm:$0xff]  ;;  %s672_s21 = smov [#allocation8]  }
  0x28   :  { %537 = vmatprep.subr.bf16.mxu1 %v669_v0  ;;  %475 = vmatprep.mubr.msk.f32.mxu1 %vm670_vm0, %v671_v1  ;;  %v514_v5 = vpack.c.bf16 %v47_v3, %v46_v2  ;;  %v517_v7 = vpack.c.bf16 %v49_v6, %v48_v4  ;;  %v50_v8 = vld [vmem:[#allocation6 + $0x20] sm:$0xff]  ;;  %v51_v9 = vld [vmem:[#allocation6 + $0x28] sm:$0xff]  ;;  %v143_v12 = vld [vmem:[#allocation6 + $0x90] sm:$0xff]  ;;  %s342_s22 = sshll.u32 %s672_s21, 4  ;;  %s343_s22 = int_to_ptr.vmem [resolvable:$true] %s342_s22 }
  0x29   :  { %v141_v10 = vld [vmem:[#allocation6 + $0x80] sm:$0xff]  ;;  %v142_v11 = vld [vmem:[#allocation6 + $0x88] sm:$0xff]  ;;  %v144_v13 = vld [vmem:[#allocation6 + $0x98] sm:$0xff]  ;;  %v520_v14 = vpack.c.bf16 %v51_v9, %v50_v8  ;;  %s637_s23 = scalar_lea.vmem %s343_s22, 128  ;;  %p642_p3 = scmp.lt.s32.totalorder %s343_s22, %s343_s22 }
  0x2a   :  { %515 = vmatpush3.bf16.msra.mxu0 %v514_v5  ;;  %v538_v15 = vpack.c.bf16 %v142_v11, %v141_v10  ;;  %v52_v16 = vld [vmem:[#allocation6 + $0x30] sm:$0xff]  ;;  %v53_v17 = vld [vmem:[#allocation6 + $0x38] sm:$0xff]  ;;  %v541_v18 = vpack.c.bf16 %v144_v13, %v143_v12  ;;  %v145_v19 = vld [vmem:[#allocation6 + $0xa0] sm:$0xff]  ;;  %p638_p2 = scmp.ne.s32.totalorder %s343_s22, %s637_s23  ;;  %p643_p4 = scmp.lt.s32.totalorder %s637_s23, %s637_s23 }
  0x2b   :  { %516 = vmatprep.subr.bf16.mxu0 %v669_v0  ;;  %v146_v20 = vld [vmem:[#allocation6 + $0xa8] sm:$0xff]  ;;  %v523_v21 = vpack.c.bf16 %v53_v17, %v52_v16  ;;  %v54_v22 = vld [vmem:[#allocation6 + $0x40] sm:$0xff]  ;;  %v147_v25 = vld [vmem:[#allocation6 + $0xb0] sm:$0xff] }
  0x2c   :  { %539 = vmatpush3.bf16.msra.mxu1 %v538_v15  ;;  %v55_v23 = vld [vmem:[#allocation6 + $0x48] sm:$0xff]  ;;  %v544_v24 = vpack.c.bf16 %v146_v20, %v145_v19  ;;  %v148_v26 = vld [vmem:[#allocation6 + $0xb8] sm:$0xff]  ;;  %v56_v28 = vld [vmem:[#allocation6 + $0x50] sm:$0xff]  ;;  %p644_p5 = por %p643_p4, %p642_p3 }
  0x2d   :  { %540 = vmatprep.subr.bf16.mxu1 %v669_v0  ;;  %v526_v27 = vpack.c.bf16 %v55_v23, %v54_v22  ;;  %v57_v29 = vld [vmem:[#allocation6 + $0x58] sm:$0xff]  ;;  %v547_v30 = vpack.c.bf16 %v148_v26, %v147_v25  ;;  %v149_v31 = vld [vmem:[#allocation6 + $0xc0] sm:$0xff]  ;;  %v150_v32 = vld [vmem:[#allocation6 + $0xc8] sm:$0xff]  ;;  %v333_v25 = vstv %s786_s3 }
  0x2e   :  { %518 = vmatpush3.bf16.msra.mxu0 %v517_v7  ;;  %v529_v33 = vpack.c.bf16 %v57_v29, %v56_v28  ;;  %v58_v34 = vld [vmem:[#allocation6 + $0x60] sm:$0xff]  ;;  %v59_v35 = vld [vmem:[#allocation6 + $0x68] sm:$0xff]  ;;  %v550_v36 = vpack.c.bf16 %v150_v32, %v149_v31  ;;  %v151_v37 = vld [vmem:[#allocation6 + $0xd0] sm:$0xff]  ;;  %p645_p6 = pnand %p644_p5, %p638_p2 }
  0x2f   :  { %519 = vmatprep.subr.bf16.mxu0 %v669_v0  ;;  %v152_v38 = vld [vmem:[#allocation6 + $0xd8] sm:$0xff]  ;;  %v532_v39 = vpack.c.bf16 %v59_v35, %v58_v34  ;;  %v60_v40 = vld [vmem:[#allocation6 + $0x70] sm:$0xff]  ;;  %v153_v43 = vld [vmem:[#allocation6 + $0xe0] sm:$0xff] }
  0x30   :  { %542 = vmatpush3.bf16.msra.mxu1 %v541_v18  ;;  %v61_v41 = vld [vmem:[#allocation6 + $0x78] sm:$0xff]  ;;  %v553_v42 = vpack.c.bf16 %v152_v38, %v151_v37  ;;  %v154_v44 = vld [vmem:[#allocation6 + $0xe8] sm:$0xff]  ;;  %v155_v48 = vld [vmem:[#allocation6 + $0xf0] sm:$0xff] }
  0x31   :  { %543 = vmatprep.subr.bf16.mxu1 %v669_v0  ;;  %v535_v45 = vpack.c.bf16 %v61_v41, %v60_v40  ;;  %v556_v46 = vpack.c.bf16 %v154_v44, %v153_v43  ;;  %v45_v47 = vld [vmem:[#allocation3] sm:$0xff]  ;;  %v237_v51 = vld [vmem:[#allocation6 + $0x100] sm:$0xff]  ;;  %v238_v52 = vld [vmem:[#allocation6 + $0x108] sm:$0xff] }
  0x32   :  { %521 = vmatpush3.bf16.msra.mxu0 %v520_v14  ;;  %v156_v49 = vld [vmem:[#allocation6 + $0xf8] sm:$0xff]  ;;  %v239_v53 = vld [vmem:[#allocation6 + $0x110] sm:$0xff]  ;;  %v562_v54 = vpack.c.bf16 %v238_v52, %v237_v51  ;;  %v241_v57 = vld [vmem:[#allocation6 + $0x120] sm:$0xff] }
  0x33   :  { %522 = vmatprep.subr.bf16.mxu0 %v669_v0  ;;  %v559_v50 = vpack.c.bf16 %v156_v49, %v155_v48  ;;  %v240_v55 = vld [vmem:[#allocation6 + $0x118] sm:$0xff]  ;;  %v242_v58 = vld [vmem:[#allocation6 + $0x128] sm:$0xff]  ;;  %v243_v60 = vld [vmem:[#allocation6 + $0x130] sm:$0xff] }
  0x34   :  { %545 = vmatpush3.bf16.msra.mxu1 %v544_v24  ;;  %v565_v56 = vpack.c.bf16 %v240_v55, %v239_v53  ;;  %v568_v59 = vpack.c.bf16 %v242_v58, %v241_v57  ;;  %v244_v61 = vld [vmem:[#allocation6 + $0x138] sm:$0xff]  ;;  %v245_v63 = vld [vmem:[#allocation6 + $0x140] sm:$0xff]  ;;  %v247_v3 = vld [vmem:[#allocation6 + $0x150] sm:$0xff] }
  0x35   :  { %546 = vmatprep.subr.bf16.mxu1 %v669_v0  ;;  %v571_v62 = vpack.c.bf16 %v244_v61, %v243_v60  ;;  %v248_v4 = vld [vmem:[#allocation6 + $0x158] sm:$0xff]  ;;  %v249_v6 = vld [vmem:[#allocation6 + $0x160] sm:$0xff]  ;;  %v250_v7 = vld [vmem:[#allocation6 + $0x168] sm:$0xff] }
  0x36   :  { %524 = vmatpush3.bf16.msra.mxu0 %v523_v21  ;;  %v577_v5 = vpack.c.bf16 %v248_v4, %v247_v3  ;;  %v580_v8 = vpack.c.bf16 %v250_v7, %v249_v6  ;;  %v352_v9 = vld [vmem:[%s785_s2] ss:$0 sm:$0xff]  ;;  %v251_v14 = vld [vmem:[#allocation6 + $0x170] sm:$0xff]  ;;  %v354_v17 = vld [vmem:[%s785_s2 + $0x1] ss:$0 sm:$0xff] }
  0x37   :  { %525 = vmatprep.subr.bf16.mxu0 %v669_v0  ;;  %v252_v15 = vld [vmem:[#allocation6 + $0x178] sm:$0xff] }
  0x38   :  { %548 = vmatpush3.bf16.msra.mxu1 %v547_v30  ;;  %v583_v16 = vpack.c.bf16 %v252_v15, %v251_v14  ;;  %v356_v21 = vld [vmem:[%s785_s2 + $0x2] ss:$0 sm:$0xff] }
  0x39   :  { %549 = vmatprep.subr.bf16.mxu1 %v669_v0 }
  0x3a   :  { %527 = vmatpush3.bf16.msra.mxu0 %v526_v27 }
  0x3b   :  { %528 = vmatprep.subr.bf16.mxu0 %v669_v0 }
  0x3c   :  { %551 = vmatpush3.bf16.msra.mxu1 %v550_v36 }
  0x3d   :  { %552 = vmatprep.subr.bf16.mxu1 %v669_v0 }
  0x3e   :  { %530 = vmatpush3.bf16.msra.mxu0 %v529_v33 }
  0x3f   :  { %531 = vmatprep.subr.bf16.mxu0 %v669_v0 }
  0x40   :  { %554 = vmatpush3.bf16.msra.mxu1 %v553_v42 }
  0x41   :  { %555 = vmatprep.subr.bf16.mxu1 %v669_v0 }
  0x42   :  { %533 = vmatpush3.bf16.msra.mxu0 %v532_v39 }
  0x43   :  { %534 = vmatprep.subr.bf16.mxu0 %v669_v0 }
  0x44   :  { %557 = vmatpush3.bf16.msra.mxu1 %v556_v46 }
  0x45   :  { %558 = vmatprep.subr.bf16.mxu1 %v669_v0 }
  0x46   :  { %536 = vmatpush3.bf16.msra.mxu0 %v535_v45 }
  0x47   :  { %561 = vmatprep.subr.bf16.mxu0 %v669_v0 }
  0x48   :  { %560 = vmatpush3.bf16.msra.mxu1 %v559_v50 }
  0x49   :  { %441 = vmatmul.mubr.f32.vlgmr.msra.gmra.mrb[0].mxu0 %v45_v47 }
  0x4a   :  { %510 = vmatprep.mubr.msk.f32.mxu0 %vm670_vm0, %v671_v1  ;;  %563 = vmatpush3.bf16.msra.mxu0 %v562_v54  ;;  %v246_v1 = vld [vmem:[#allocation6 + $0x148] sm:$0xff] }
  0x4b   :  { %564 = vmatprep.subr.bf16.mxu0 %v669_v0  ;;  %v574_v2 = vpack.c.bf16 %v246_v1, %v245_v63 }
  0x4e   :  { %566 = vmatpush3.bf16.msra.mxu0 %v565_v56 }
  0x4f   :  { %567 = vmatprep.subr.bf16.mxu0 %v669_v0 }
  0x52   :  { %569 = vmatpush3.bf16.msra.mxu0 %v568_v59 }
  0x53   :  { %570 = vmatprep.subr.bf16.mxu0 %v669_v0 }
  0x56   :  { %572 = vmatpush3.bf16.msra.mxu0 %v571_v62 }
  0x57   :  { %573 = vmatprep.subr.bf16.mxu0 %v669_v0 }
  0x5a   :  { %575 = vmatpush3.bf16.msra.mxu0 %v574_v2 }
  0x5b   :  { %576 = vmatprep.subr.bf16.mxu0 %v669_v0 }
  0x5e   :  { %578 = vmatpush3.bf16.msra.mxu0 %v577_v5 }
  0x5f   :  { %579 = vmatprep.subr.bf16.mxu0 %v669_v0 }
  0x62   :  { %581 = vmatpush3.bf16.msra.mxu0 %v580_v8 }
  0x63   :  { %582 = vmatprep.subr.bf16.mxu0 %v669_v0 }
  0x66   :  { %584 = vmatpush3.bf16.msra.mxu0 %v583_v16 }
 0x11c   :  { %v135_v10 = vpop.f32.mrb[0].mxu0 }
 0x11d   :  { %v136_v11 = vadd.f32 %v352_v9, %v135_v10  ;;  %v442_v12 = vpop.f32.mrb[1].mxu0 }
 0x11f   :  { %v139_v13 = vmax.f32 %v136_v11, 0.0 }
 0x121   :  { %476 = vmatmul.mubr.f32.vlgmr.msra.gmra.mrb[0].mxu1 %v139_v13 }
 0x1f4   :  { %v231_v18 = vpop.f32.mrb[0].mxu1 }
 0x1f5   :  { %v232_v19 = vadd.f32 %v354_v17, %v231_v18  ;;  %v477_v0 = vpop.f32.mrb[1].mxu1 }
 0x1f7   :  { %v235_v20 = vmax.f32 %v232_v19, 0.0 }
 0x1f9   :  { %511 = vmatmul.mubr.f32.vlgmr.msra.gmra.mrb[2].mxu0 %v235_v20 }
 0x2cc   :  { %v327_v22 = vpop.f32.mrb[2].mxu0 }
 0x2cd   :  { %v328_v23 = vadd.f32 %v356_v21, %v327_v22  ;;  %v512_v24 = vpop.f32.mrb[3].mxu0 }
 0x2cf   :  { %v331_v26 = vmax.f32 %v328_v23, 0.0 }
 0x2d1   :  { %v334_v27 = vmin.f32 %v331_v26, %v333_v25 }
 0x2d3   :  { %335 = vst [vmem:[#allocation8] sm:$0xff] %v334_v27 }
 0x2d4   :  { %648 = shalt.err (!%p645_p6)
}
 0x2d5   :  { %s649_s25 = scalar_lea.hbm %s787_s4, 128 }
 0x2d6   :  { %p650_p7 = scmp.ne.s32.totalorder %s787_s4, %s649_s25  ;;  %p653_p8 = scmp.lt.u32.totalorder %s649_s25, %s787_s4 }
 0x2d8   :  { %p655_p9 = pnand %p653_p8, %p650_p7 }
 0x2da   :  { %658 = shalt.err (!%p655_p9)
}
 0x2db   :  { %345 = dma.vmem_to_hbm [thread:$0]  %s343_s22, 128, %s787_s4, [#allocation5]  }
 0x2dc   :  { %663 = dma.done.wait [#allocation5], 128  }
 0x2dd   :  { %664 = vsyncadd [#allocation5], 4294967168 }
 0x2de   :  { %349 = vsyncpa [#allocation4], 1 }
 0x2df   :  { %350 = vsyncpa [#allocation7], 1 }
 0x2e0   :  { %351 = vsyncpa [#allocation5], 1 }

</bundles_post_ra>
